<compile_context>
chip_gen: v6e
topology: v6e:2x2x1
jax: 0.10.0
libtpu: 0.0.40
codegen_flags: <defaults>
</compile_context>

<pallas_src>
import functools

import jax
import jax.numpy as jnp
from jax.experimental import pallas as pl
from jax.experimental.pallas import tpu as pltpu


def _channel_attention_kernel(x_ref, w1t_ref, w2t_ref, o_ref,
                              sum_acc, max_acc, *, true_hw, grid_hw):
    """One (batch-block, spatial-block) grid step.

    x_ref:   (Bt, C, block_hw) tile of the flattened (and zero-padded) image.
    sum_acc: (Bt, C, 128) f32 running partial sums (lane-sliced, no XLU).
    max_acc: (Bt, C, 128) f32 running partial maxes.
    o_ref:   (Bt, 1, C) attention weights (written at the last spatial step).
    """
    s = pl.program_id(1)
    bt, c, block_hw = x_ref.shape
    n_slices = block_hw // 128
    padded_hw = grid_hw * block_hw
    has_pad = padded_hw != true_hw

    @pl.when(s == 0)
    def _init():
        sum_acc[...] = jnp.zeros_like(sum_acc)
        max_acc[...] = jnp.full_like(max_acc, -jnp.inf)

    # Lane-position iota, only materialized when spatial padding exists.
    lane = (jax.lax.broadcasted_iota(jnp.int32, (1, 128), 1)
            if has_pad else None)

    def masked_for_max(xs, i):
        # Padding (zero-filled by the wrapper) only ever lives in the tail of
        # the final spatial block; for the statically identified tail slices,
        # mask padded lanes to -inf so they never win the running max.
        if has_pad and (grid_hw - 1) * block_hw + (i + 1) * 128 > true_hw:
            pos = s * block_hw + i * 128 + lane          # (1, 128) int32
            return jnp.where(pos < true_hw, xs, -jnp.inf)
        return xs

    # Hot loop: static 128-wide lane slices, combined per batch row so the
    # partials stay register-sized; scratch is touched once per row per step.
    # No cross-lane reduction here -> no per-step XLU work (v7x concern).
    for b in range(bt):
        psum = None
        pmax = None
        for i in range(n_slices):
            xs = x_ref[b, :, i * 128:(i + 1) * 128].astype(jnp.float32)  # (C,128)
            xm = masked_for_max(xs, i)
            psum = xs if psum is None else psum + xs
            pmax = xm if pmax is None else jnp.maximum(pmax, xm)
        sum_acc[b, :, :] = sum_acc[b, :, :] + psum
        max_acc[b, :, :] = jnp.maximum(max_acc[b, :, :], pmax)

    @pl.when(s == grid_hw - 1)
    def _finalize():
        # Single deferred cross-lane reduce (runs once per batch block).
        avg = jnp.sum(sum_acc[...], axis=-1) * (1.0 / true_hw)   # (Bt, C)
        mx = jnp.max(max_acc[...], axis=-1)                      # (Bt, C)
        # Stack avg/max branches along sublanes -> one pass through the shared
        # MLP with a lane-dense (2*Bt, C) operand.
        pooled = jnp.concatenate([avg, mx], axis=0)              # (2*Bt, C)
        w1t = w1t_ref[...].astype(jnp.float32)                   # (C, hidden)
        w2t = w2t_ref[...].astype(jnp.float32)                   # (hidden, C)
        h = jnp.maximum(
            jnp.dot(pooled, w1t, preferred_element_type=jnp.float32), 0.0)
        o = jnp.dot(h, w2t, preferred_element_type=jnp.float32)  # (2*Bt, C)
        out = jax.nn.sigmoid(o[:bt] + o[bt:])                    # avg_out+max_out
        o_ref[...] = out.reshape(bt, 1, c).astype(o_ref.dtype)


def _largest_divisor_leq(n, cap):
    """Largest divisor of n that is <= cap (always >= 1)."""
    cap = max(1, min(n, cap))
    for d in range(cap, 0, -1):
        if n % d == 0:
            return d
    return 1


def channel_attention(x, w1, w2, *, block_batch=None, block_hw=None,
                      target_block_bytes=4 * 1024 * 1024,
                      vmem_limit_bytes=48 * 1024 * 1024,
                      prefer_multicore_grid=True):
    """CBAM channel attention.

    x:  (B, C, H, W);  w1: (C//r, C);  w2: (C, C//r)   (1x1 convs, no bias).
    Returns sigmoid(MLP(avgpool(x)) + MLP(maxpool(x))), shape (B, C, 1, 1).

    Tuning knobs (per-generation guidance):
      v7x : target_block_bytes ~6-8 MiB, vmem_limit_bytes ~40-48 MiB.
      v6e : target_block_bytes ~4-8 MiB, vmem_limit_bytes up to ~64 MiB.
      v5e : target_block_bytes ~2-3 MiB, vmem_limit_bytes ~32 MiB.
    Defaults (4 MiB / 48 MiB) are safe and near-roofline on all three.
    """
    B, C, H, W = x.shape
    HW = H * W
    hidden, c_in = w1.shape
    assert c_in == C and w2.shape == (C, hidden) and hidden >= 1
    itemsize = jnp.dtype(x.dtype).itemsize

    # --- Spatial tiling: pad HW to a multiple of 128; block_hw is the largest
    # multiple-of-128 divisor of the padded extent that keeps a Bt=1 block
    # within the byte budget (always >= 128). ---
    padded_hw = ((HW + 127) // 128) * 128
    if block_hw is None:
        max_lanes = max(128, target_block_bytes // max(1, C * itemsize))
        n128 = padded_hw // 128
        best = 1
        for d in range(1, n128 + 1):
            if n128 % d == 0 and d * 128 <= max_lanes:
                best = d
        block_hw = best * 128
    assert block_hw % 128 == 0 and padded_hw % block_hw == 0

    # --- Batch tiling: pack several images per grid step up to the byte
    # budget; keep grid[0] >= 2 whenever B >= 2 so the "parallel" batch axis
    # can be split across TensorCores (v7x megacore). ---
    if block_batch is None:
        budget = max(1, target_block_bytes // (C * block_hw * itemsize))
        block_batch = _largest_divisor_leq(B, budget)
        if prefer_multicore_grid and B >= 2 and B // block_batch < 2:
            block_batch = _largest_divisor_leq(B, B // 2)
    assert B % block_batch == 0

    x_flat = x.reshape(B, C, HW)
    if padded_hw != HW:
        # Zero padding: harmless for the sum (mean uses the true HW), and the
        # kernel masks padded lanes to -inf for the max reduction.
        x_flat = jnp.pad(x_flat, ((0, 0), (0, 0), (0, padded_hw - HW)))

    # Pre-transpose the tiny weights once so the in-kernel MXU matmuls are
    # plain row-major (no in-kernel transpose / relayout).
    w1t = jnp.transpose(w1)   # (C, hidden)
    w2t = jnp.transpose(w2)   # (hidden, C)

    grid_b = B // block_batch
    grid_hw = padded_hw // block_hw

    out = pl.pallas_call(
        functools.partial(_channel_attention_kernel,
                          true_hw=HW, grid_hw=grid_hw),
        out_shape=jax.ShapeDtypeStruct((B, 1, C), x.dtype),
        grid_spec=pltpu.PrefetchScalarGridSpec(
            num_scalar_prefetch=0,
            grid=(grid_b, grid_hw),
            in_specs=[
                pl.BlockSpec((block_batch, C, block_hw),
                             lambda b, s: (b, 0, s)),
                pl.BlockSpec((C, hidden), lambda b, s: (0, 0)),
                pl.BlockSpec((hidden, C), lambda b, s: (0, 0)),
            ],
            out_specs=pl.BlockSpec((block_batch, 1, C),
                                   lambda b, s: (b, 0, 0)),
            scratch_shapes=[
                pltpu.VMEM((block_batch, C, 128), jnp.float32),  # partial sums
                pltpu.VMEM((block_batch, C, 128), jnp.float32),  # partial maxes
            ],
        ),
        compiler_params=pltpu.CompilerParams(
            dimension_semantics=("parallel", "arbitrary"),
            vmem_limit_bytes=vmem_limit_bytes,
        ),
    )(x_flat, w1t, w2t)

    return out.reshape(B, C, 1, 1)


def channel_attention_ref(x, w1, w2):
    """Pure-JAX reference mirroring the PyTorch forward."""
    avg = jnp.mean(x, axis=(2, 3))  # (B, C)
    mx = jnp.max(x, axis=(2, 3))    # (B, C)

    def mlp(p):
        h = jnp.maximum(p @ w1.T, 0.0)
        return h @ w2.T

    return jax.nn.sigmoid(mlp(avg) + mlp(mx))[:, :, None, None]


if __name__ == "__main__":
    B, C = 4, 64
    reduction_ratio = 16
    hidden = C // reduction_ratio

    key = jax.random.PRNGKey(0)
    kx, kx2, k1, k2 = jax.random.split(key, 4)

    # Deterministic "kaiming-ish" init for the two 1x1 conv weights (no bias).
    w1 = jax.random.normal(k1, (hidden, C), dtype=jnp.float32) * (2.0 / C) ** 0.5
    w2 = jax.random.normal(k2, (C, hidden), dtype=jnp.float32) * (2.0 / hidden) ** 0.5

    # 1) Default heuristics on a 128-multiple spatial extent (16x16 = 256).
    x16 = jax.random.normal(kx, (B, C, 16, 16), dtype=jnp.float32)
    ref16 = channel_attention_ref(x16, w1, w2)
    out16 = jax.block_until_ready(channel_attention(x16, w1, w2))
    assert out16.shape == (B, C, 1, 1)
    assert jnp.allclose(out16, ref16, atol=1e-5, rtol=1e-5)

    # 2) Explicit tiling: exercises the running accumulators across the
    #    "arbitrary" spatial grid axis (grid = (2, 2)).
    out16_t = jax.block_until_ready(
        channel_attention(x16, w1, w2, block_batch=2, block_hw=128))
    assert jnp.allclose(out16_t, ref16, atol=1e-5, rtol=1e-5)

    # 3) Non-128-multiple spatial extent (14x14 = 196): exercises the
    #    zero-pad + masked-max path, both single- and multi-step spatial grids.
    x14 = jax.random.normal(kx2, (B, C, 14, 14), dtype=jnp.float32)
    ref14 = channel_attention_ref(x14, w1, w2)
    out14 = jax.block_until_ready(channel_attention(x14, w1, w2))
    assert jnp.allclose(out14, ref14, atol=1e-5, rtol=1e-5)
    out14_t = jax.block_until_ready(
        channel_attention(x14, w1, w2, block_batch=2, block_hw=128))
    assert jnp.allclose(out14_t, ref14, atol=1e-5, rtol=1e-5)

    # 4) bf16 activations streamed from HBM (f32 accumulation inside).
    x16_bf16 = x16.astype(jnp.bfloat16)
    ref_bf16 = channel_attention_ref(x16_bf16.astype(jnp.float32), w1, w2)
    out_bf16 = jax.block_until_ready(channel_attention(x16_bf16, w1, w2))
    assert out_bf16.dtype == jnp.bfloat16
    assert jnp.allclose(out_bf16.astype(jnp.float32), ref_bf16, atol=1e-2)

    print("KERNEL_OK")
</pallas_src>

<mosaic_0001>
module attributes {stable_mosaic.version = 11 : i64} {
  func.func @_channel_attention_kernel(%arg0: i32, %arg1: i32, %arg2: memref<2x64x256xf32, #tpu.memory_space<vmem>>, %arg3: memref<64x4xf32, #tpu.memory_space<vmem>>, %arg4: memref<4x64xf32, #tpu.memory_space<vmem>>, %arg5: memref<2x1x64xf32, #tpu.memory_space<vmem>>, %arg6: memref<2x64x128xf32, #tpu.memory_space<vmem>>, %arg7: memref<2x64x128xf32, #tpu.memory_space<vmem>>) attributes {dimension_semantics = [#tpu.dimension_semantics<parallel>, #tpu.dimension_semantics<arbitrary>], iteration_bounds = array<i64: 2, 1>, scalar_prefetch = 0 : i64, scratch_operands = 2 : i64, tpu.core_type = #tpu.core_type<tc>, window_params = [{transform_indices = @transform_0, window_bounds = array<i64: 2, 64, 256>}, {pipeline_mode = #tpu.pipeline_mode<synchronous>, transform_indices = @transform_1, window_bounds = array<i64: 64, 4>}, {pipeline_mode = #tpu.pipeline_mode<synchronous>, transform_indices = @transform_2, window_bounds = array<i64: 4, 64>}, {transform_indices = @transform_3, window_bounds = array<i64: 2, 1, 64>}]} {
    %c0_i32 = arith.constant 0 : i32
    %0 = arith.cmpi eq, %arg1, %c0_i32 : i32
    %1 = arith.extui %0 : i1 to i32
    %c0_i32_0 = arith.constant 0 : i32
    %2 = arith.cmpi ne, %1, %c0_i32_0 : i32
    scf.if %2 {
      %cst = arith.constant 0.000000e+00 : f32
      %42 = vector.broadcast %cst : f32 to vector<2x64x128xf32>
      %c0_36 = arith.constant 0 : index
      %c0_37 = arith.constant 0 : index
      %c0_38 = arith.constant 0 : index
      %43 = vector.load %arg6[%c0_36, %c0_37, %c0_38] : memref<2x64x128xf32, #tpu.memory_space<vmem>>, vector<2x64x128xf32>
      tpu.vector_store %arg6[%c0_36, %c0_37, %c0_38], %42 {strides = array<i32>} : memref<2x64x128xf32, #tpu.memory_space<vmem>>, vector<2x64x128xf32>,
      %cst_39 = arith.constant 0xFF800000 : f32
      %44 = vector.broadcast %cst_39 : f32 to vector<2x64x128xf32>
      %c0_40 = arith.constant 0 : index
      %c0_41 = arith.constant 0 : index
      %c0_42 = arith.constant 0 : index
      %45 = vector.load %arg7[%c0_40, %c0_41, %c0_42] : memref<2x64x128xf32, #tpu.memory_space<vmem>>, vector<2x64x128xf32>
      tpu.vector_store %arg7[%c0_40, %c0_41, %c0_42], %44 {strides = array<i32>} : memref<2x64x128xf32, #tpu.memory_space<vmem>>, vector<2x64x128xf32>,
    } else {
    }
    %c0 = arith.constant 0 : index
    %c0_1 = arith.constant 0 : index
    %c0_2 = arith.constant 0 : index
    %3 = vector.load %arg2[%c0, %c0_1, %c0_2] : memref<2x64x256xf32, #tpu.memory_space<vmem>>, vector<1x64x128xf32>
    %4 = vector.shape_cast %3 : vector<1x64x128xf32> to vector<64x128xf32>
    %c0_3 = arith.constant 0 : index
    %c0_4 = arith.constant 0 : index
    %c128 = arith.constant 128 : index
    %5 = vector.load %arg2[%c0_3, %c0_4, %c128] : memref<2x64x256xf32, #tpu.memory_space<vmem>>, vector<1x64x128xf32>
    %6 = vector.shape_cast %5 : vector<1x64x128xf32> to vector<64x128xf32>
    %7 = arith.addf %4, %6 : vector<64x128xf32>
    %8 = arith.maximumf %4, %6 : vector<64x128xf32>
    %c0_5 = arith.constant 0 : index
    %c0_6 = arith.constant 0 : index
    %c0_7 = arith.constant 0 : index
    %9 = vector.load %arg6[%c0_5, %c0_6, %c0_7] : memref<2x64x128xf32, #tpu.memory_space<vmem>>, vector<1x64x128xf32>
    %10 = vector.shape_cast %9 : vector<1x64x128xf32> to vector<64x128xf32>
    %11 = arith.addf %10, %7 : vector<64x128xf32>
    %c0_8 = arith.constant 0 : index
    %c0_9 = arith.constant 0 : index
    %c0_10 = arith.constant 0 : index
    %12 = vector.load %arg6[%c0_8, %c0_9, %c0_10] : memref<2x64x128xf32, #tpu.memory_space<vmem>>, vector<1x64x128xf32>
    %13 = vector.shape_cast %12 : vector<1x64x128xf32> to vector<64x128xf32>
    %14 = vector.shape_cast %11 : vector<64x128xf32> to vector<1x64x128xf32>
    tpu.vector_store %arg6[%c0_8, %c0_9, %c0_10], %14 {strides = array<i32>} : memref<2x64x128xf32, #tpu.memory_space<vmem>>, vector<1x64x128xf32>,
    %c0_11 = arith.constant 0 : index
    %c0_12 = arith.constant 0 : index
    %c0_13 = arith.constant 0 : index
    %15 = vector.load %arg7[%c0_11, %c0_12, %c0_13] : memref<2x64x128xf32, #tpu.memory_space<vmem>>, vector<1x64x128xf32>
    %16 = vector.shape_cast %15 : vector<1x64x128xf32> to vector<64x128xf32>
    %17 = arith.maximumf %16, %8 : vector<64x128xf32>
    %c0_14 = arith.constant 0 : index
    %c0_15 = arith.constant 0 : index
    %c0_16 = arith.constant 0 : index
    %18 = vector.load %arg7[%c0_14, %c0_15, %c0_16] : memref<2x64x128xf32, #tpu.memory_space<vmem>>, vector<1x64x128xf32>
    %19 = vector.shape_cast %18 : vector<1x64x128xf32> to vector<64x128xf32>
    %20 = vector.shape_cast %17 : vector<64x128xf32> to vector<1x64x128xf32>
    tpu.vector_store %arg7[%c0_14, %c0_15, %c0_16], %20 {strides = array<i32>} : memref<2x64x128xf32, #tpu.memory_space<vmem>>, vector<1x64x128xf32>,
    %c1 = arith.constant 1 : index
    %c0_17 = arith.constant 0 : index
    %c0_18 = arith.constant 0 : index
    %21 = vector.load %arg2[%c1, %c0_17, %c0_18] : memref<2x64x256xf32, #tpu.memory_space<vmem>>, vector<1x64x128xf32>
    %22 = vector.shape_cast %21 : vector<1x64x128xf32> to vector<64x128xf32>
    %c1_19 = arith.constant 1 : index
    %c0_20 = arith.constant 0 : index
    %c128_21 = arith.constant 128 : index
    %23 = vector.load %arg2[%c1_19, %c0_20, %c128_21] : memref<2x64x256xf32, #tpu.memory_space<vmem>>, vector<1x64x128xf32>
    %24 = vector.shape_cast %23 : vector<1x64x128xf32> to vector<64x128xf32>
    %25 = arith.addf %22, %24 : vector<64x128xf32>
    %26 = arith.maximumf %22, %24 : vector<64x128xf32>
    %c1_22 = arith.constant 1 : index
    %c0_23 = arith.constant 0 : index
    %c0_24 = arith.constant 0 : index
    %27 = vector.load %arg6[%c1_22, %c0_23, %c0_24] : memref<2x64x128xf32, #tpu.memory_space<vmem>>, vector<1x64x128xf32>
    %28 = vector.shape_cast %27 : vector<1x64x128xf32> to vector<64x128xf32>
    %29 = arith.addf %28, %25 : vector<64x128xf32>
    %c1_25 = arith.constant 1 : index
    %c0_26 = arith.constant 0 : index
    %c0_27 = arith.constant 0 : index
    %30 = vector.load %arg6[%c1_25, %c0_26, %c0_27] : memref<2x64x128xf32, #tpu.memory_space<vmem>>, vector<1x64x128xf32>
    %31 = vector.shape_cast %30 : vector<1x64x128xf32> to vector<64x128xf32>
    %32 = vector.shape_cast %29 : vector<64x128xf32> to vector<1x64x128xf32>
    tpu.vector_store %arg6[%c1_25, %c0_26, %c0_27], %32 {strides = array<i32>} : memref<2x64x128xf32, #tpu.memory_space<vmem>>, vector<1x64x128xf32>,
    %c1_28 = arith.constant 1 : index
    %c0_29 = arith.constant 0 : index
    %c0_30 = arith.constant 0 : index
    %33 = vector.load %arg7[%c1_28, %c0_29, %c0_30] : memref<2x64x128xf32, #tpu.memory_space<vmem>>, vector<1x64x128xf32>
    %34 = vector.shape_cast %33 : vector<1x64x128xf32> to vector<64x128xf32>
    %35 = arith.maximumf %34, %26 : vector<64x128xf32>
    %c1_31 = arith.constant 1 : index
    %c0_32 = arith.constant 0 : index
    %c0_33 = arith.constant 0 : index
    %36 = vector.load %arg7[%c1_31, %c0_32, %c0_33] : memref<2x64x128xf32, #tpu.memory_space<vmem>>, vector<1x64x128xf32>
    %37 = vector.shape_cast %36 : vector<1x64x128xf32> to vector<64x128xf32>
    %38 = vector.shape_cast %35 : vector<64x128xf32> to vector<1x64x128xf32>
    tpu.vector_store %arg7[%c1_31, %c0_32, %c0_33], %38 {strides = array<i32>} : memref<2x64x128xf32, #tpu.memory_space<vmem>>, vector<1x64x128xf32>,
    %c0_i32_34 = arith.constant 0 : i32
    %39 = arith.cmpi eq, %arg1, %c0_i32_34 : i32
    %40 = arith.extui %39 : i1 to i32
    %c0_i32_35 = arith.constant 0 : i32
    %41 = arith.cmpi ne, %40, %c0_i32_35 : i32
    scf.if %41 {
      %c0_36 = arith.constant 0 : index
      %c0_37 = arith.constant 0 : index
      %c0_38 = arith.constant 0 : index
      %42 = vector.load %arg6[%c0_36, %c0_37, %c0_38] : memref<2x64x128xf32, #tpu.memory_space<vmem>>, vector<2x64x128xf32>
      %cst = arith.constant dense<0.000000e+00> : vector<2x64xf32>
      %43 = vector.multi_reduction <add>, %42, %cst [2] : vector<2x64x128xf32> to vector<2x64xf32>
      %cst_39 = arith.constant 3.906250e-03 : f32
      %44 = vector.broadcast %cst_39 : f32 to vector<2x64xf32>
      %45 = arith.mulf %43, %44 : vector<2x64xf32>
      %c0_40 = arith.constant 0 : index
      %c0_41 = arith.constant 0 : index
      %c0_42 = arith.constant 0 : index
      %46 = vector.load %arg7[%c0_40, %c0_41, %c0_42] : memref<2x64x128xf32, #tpu.memory_space<vmem>>, vector<2x64x128xf32>
      %cst_43 = arith.constant dense<0xFF800000> : vector<2x64xf32>
      %47 = vector.multi_reduction <maximumf>, %46, %cst_43 [2] : vector<2x64x128xf32> to vector<2x64xf32>
      %48 = tpu.concatenate %45, %47 in 0 : vector<2x64xf32>, vector<2x64xf32> -> vector<4x64xf32>
      %c0_44 = arith.constant 0 : index
      %c0_45 = arith.constant 0 : index
      %49 = vector.load %arg3[%c0_44, %c0_45] : memref<64x4xf32, #tpu.memory_space<vmem>>, vector<64x4xf32>
      %c0_46 = arith.constant 0 : index
      %c0_47 = arith.constant 0 : index
      %50 = vector.load %arg4[%c0_46, %c0_47] : memref<4x64xf32, #tpu.memory_space<vmem>>, vector<4x64xf32>
      %cst_48 = arith.constant dense<0.000000e+00> : vector<4x4xf32>
      %51 = tpu.matmul %48, %49, %cst_48 {dimension_numbers = #tpu.dot_dimension_numbers<[1], [0], [0], [1], [0, 0, 1, 1], [], []>} : vector<4x64xf32>, vector<64x4xf32>, vector<4x4xf32> -> vector<4x4xf32>
      %cst_49 = arith.constant 0.000000e+00 : f32
      %52 = vector.broadcast %cst_49 : f32 to vector<4x4xf32>
      %53 = arith.maximumf %51, %52 : vector<4x4xf32>
      %cst_50 = arith.constant dense<0.000000e+00> : vector<4x64xf32>
      %54 = tpu.matmul %53, %50, %cst_50 {dimension_numbers = #tpu.dot_dimension_numbers<[1], [0], [0], [1], [0, 0, 1, 1], [], []>} : vector<4x4xf32>, vector<4x64xf32>, vector<4x64xf32> -> vector<4x64xf32>
      %55 = vector.extract_strided_slice %54 {offsets = [0, 0], sizes = [2, 64], strides = [1, 1]} : vector<4x64xf32> to vector<2x64xf32>
      %56 = vector.extract_strided_slice %54 {offsets = [2, 0], sizes = [2, 64], strides = [1, 1]} : vector<4x64xf32> to vector<2x64xf32>
      %57 = arith.addf %55, %56 : vector<2x64xf32>
      %58 = arith.negf %57 : vector<2x64xf32>
      %59 = math.exp %58 : vector<2x64xf32>
      %cst_51 = arith.constant 1.000000e+00 : f32
      %60 = vector.broadcast %cst_51 : f32 to vector<2x64xf32>
      %61 = arith.addf %60, %59 : vector<2x64xf32>
      %62 = arith.divf %60, %61 : vector<2x64xf32>
      %63 = vector.shape_cast %62 : vector<2x64xf32> to vector<2x1x64xf32>
      %c0_52 = arith.constant 0 : index
      %c0_53 = arith.constant 0 : index
      %c0_54 = arith.constant 0 : index
      %64 = vector.load %arg5[%c0_52, %c0_53, %c0_54] : memref<2x1x64xf32, #tpu.memory_space<vmem>>, vector<2x1x64xf32>
      tpu.vector_store %arg5[%c0_52, %c0_53, %c0_54], %63 {strides = array<i32>} : memref<2x1x64xf32, #tpu.memory_space<vmem>>, vector<2x1x64xf32>,
    } else {
    }
    return
  }
  func.func @transform_0(%arg0: i32, %arg1: i32) -> (i32, i32, i32) {
    %c0_i32 = arith.constant 0 : i32
    %c0_i32_0 = arith.constant 0 : i32
    return %arg0, %c0_i32, %arg1 : i32, i32, i32
  }
  func.func @transform_1(%arg0: i32, %arg1: i32) -> (i32, i32) {
    %c0_i32 = arith.constant 0 : i32
    %c0_i32_0 = arith.constant 0 : i32
    %c0_i32_1 = arith.constant 0 : i32
    return %c0_i32, %c0_i32_0 : i32, i32
  }
  func.func @transform_2(%arg0: i32, %arg1: i32) -> (i32, i32) {
    %c0_i32 = arith.constant 0 : i32
    %c0_i32_0 = arith.constant 0 : i32
    %c0_i32_1 = arith.constant 0 : i32
    return %c0_i32, %c0_i32_0 : i32, i32
  }
  func.func @transform_3(%arg0: i32, %arg1: i32) -> (i32, i32, i32) {
    %c0_i32 = arith.constant 0 : i32
    %c0_i32_0 = arith.constant 0 : i32
    %c0_i32_1 = arith.constant 0 : i32
    return %arg0, %c0_i32, %c0_i32_0 : i32, i32, i32
  }
}

</mosaic_0001>

<bundles_post_ra>
// kernel: tpu_custom_call.1
= control target key start
LH: loop header
LB: loop body
LE: loop exit
PB: predicated region body
PF: predicated region fallthrough
CT: control target
= control target key end

     0   :  { %8 = vsyncpa [#allocation5], 0  ;;  %s1646_s0 = inlined_call_operand.hbm [shape: f32[4,64,256], index: 0, kind: input, shape index: {}]   ;;  %s1647_s1 = inlined_call_operand.vmem [shape: f32[64,4], index: 1, kind: input, shape index: {}]   ;;  %s1648_s2 = inlined_call_operand.vmem [shape: f32[4,64], index: 2, kind: input, shape index: {}]   ;;  %s1649_s3 = inlined_call_operand.hbm [shape: f32[4,1,64], index: 3, kind: output, shape index: {}]  }
   0x1   :  { %10 = vsyncpa [#allocation5 + $0x1], 0 }
   0x2   :  { %11 = vsyncpa [#allocation6], 0 }
   0x3   :  { %13 = vsyncpa [#allocation6 + $0x1], 0  ;;  %s1319_s12 = smov 0   ;;  %s1321_s13 = smov 0  }
   0x4   :  { %s1323_s14 = smov 0   ;;  %s1325_s15 = smov 0  }
   0x5   :  { %s1327_s16 = smov 0   ;;  %s1329_s17 = smov 0  }
   0x6 LB: > { %s1033_s18 = sadd.s32 4294967295, %s1288_s17   ;;  %s1034_s19 = sadd.s32 4294967294, %s1288_s17   ;;  %s1288_s17 = sphi %s1329_s17, %s19_s17   ;;  %s1284_s16 = sphi %s1327_s16, %s1660_s16   ;;  %s1280_s15 = sphi %s1325_s15, %s1659_s15   ;;  %s1276_s14 = sphi %s1323_s14, %s1658_s14   ;;  %s1272_s13 = sphi %s1321_s13, %s1657_s13   ;;  %s1268_s12 = sphi %s1319_s12, %s1656_s12  }
   0x7   : > { %s31_s20 = sadd.s32 1, %s1284_s16  ;;  %s40_s21 = sadd.s32 1, %s1276_s14 }
   0x8   : > { %p33_p0 = scmp.ge.s32.totalorder %s31_s20, 2  ;;  %p47_p1 = scmp.ne.s32.totalorder %s1276_s14, %s1272_s13 }
   0x9   : > { %p48_p2 = scmp.eq.s32.totalorder %s1288_s17, 0  ;;  %p53_p3 = scmp.ne.s32.totalorder %s1272_s13, %s1268_s12 }
   0xa   : > { %s1662_s20 = smov (%p33_p0, %s31_s20), 0  ;;  %p54_p5 = scmp.eq.s32.totalorder %s1033_s18, 0 }
   0xb   : > { %p1360_p4 = por %p48_p2, %p47_p1  ;;  %s35_s23 = ssub.s32 %s1284_s16, %s1662_s20 }
   0xc   : > { %p119_p6 = scmp.eq.s32.totalorder %s1033_s18, 1  ;;  %p38_p7 = scmp.eq.s32.totalorder %s35_s23, 0 }
   0xd   : > { %p1366_p8 = por %p54_p5, %p53_p3  ;;  %p125_p10 = scmp.eq.s32.totalorder %s1034_s19, 1 }
   0xe   : > { %p1370_p9 = por %p119_p6, %p47_p1  ;;  %p1119_p13 = scmp.lt.s32.totalorder %s1288_s17, 2 }
   0xf   : > { %s1375_s26 = scalar_select %p38_p7, %s1276_s14, %s40_s21  }
  0x10   : > { %p1377_p11 = por %p125_p10, %p53_p3  ;;  %s151_s28 = sand.u32 1, %s1276_s14  }
  0x11   : > { %s1037_s29 = sshll.u32 %s151_s28, 8  ;;  %s1070_s30 = sshll.u32 %s1284_s16, 12 }
  0x12   : > { %s164_s6 = scalar_lea.hbm %s1646_s0, %s1070_s30  ;;  %s155_s7 = scalar_lea.vmem [#allocation4], %s1037_s29 }
  0x13   : > { %s165_s8 = sshll.u32 %s155_s7, 4  ;;  %p1390_p0 = pnand %p1119_p13, %p1360_p4  ;;  %s166_s8 = int_to_ptr.vmem [resolvable:$true] %s165_s8 }
  0x14   : > { %p1041_p1 = scmp.ge.s32.totalorder %s1288_s17, 1  ;;  %s152_s10 = scalar_lea.sflag [#allocation5], %s151_s28 }
  0x15   : > { %p1182_p2 = pneg %p1390_p0  ;;  %s1193_s11 = scalar_lea.vmem %s166_s8, 4096 }
  0x16   : > { %p1194_p3 = scmp.ne.s32.totalorder %s166_s8, %s1193_s11  ;;  %s1290_s18 = smov [#allocation4]  }
  0x17   : > { %s1198_s19 = sshll.u32 %s1290_s18, 4  ;;  %s1199_s19 = int_to_ptr.vmem [resolvable:$false] %s1198_s19 }
  0x18   : > { %p1196_p5 = pnand %p1194_p3, %p1182_p2  ;;  %s1200_s21 = scalar_lea.vmem %s1199_s19, 8192 }
  0x19   : > { %p1201_p7 = scmp.lt.s32.totalorder %s166_s8, %s1199_s19  ;;  %p1202_p10 = scmp.lt.s32.totalorder %s1200_s21, %s1193_s11 }
  0x1a   : > { %p1197_p6 = pneg %p1196_p5 }
  0x1b   : > { %p1203_p12 = por %p1202_p10, %p1201_p7 }
  0x1d   : > { %p1204_p4 = pnand %p1203_p12, %p1197_p6 }
  0x1f   : > { %1207 = shalt.err (!%p1204_p4)
}
  0x20   : > { %s1291_s22 = smov 256   ;;  %s1292_s23 = smov 16  }
  0x21   : > { %1114 = dma.hbm_to_vmem [thread:$0]  (!%p1390_p0), %s164_s6, 4096, %s166_s8, %s152_s10, %s1291_s22, %s1291_s22, %s1292_s23  }
  0x22   : > { %p173_p13 = scmp.lt.s32.totalorder %s1288_s17, 3 }
  0x24   : > { %p174_p2 = pnand %p1041_p1, %p173_p13 }
  0x25   : > { %s1403_s28 = sand.u32 (!%p174_p2), 1, %s1272_s13  }
  0x26   : > { %177 = sbr.rel (%p174_p2) target bundleno = 695 (0x2b7), region = 32  ;;  %s1042_s29 = sshll.u32 (!%p174_p2), %s1403_s28, 8 }
  0x27   : > { %s180_s30 = scalar_lea.sflag (!%p174_p2), [#allocation5], %s1403_s28  ;;  %s1407_s4 = scalar_lea.vmem (!%p174_p2), [#allocation4], %s1042_s29 }
  0x2b   : > { %1259 = dma.done.wait (%p1366_p8), %s180_s30, 4096  }
  0x2c   : > { %1261 = vsyncadd (%p1366_p8), %s180_s30, 4294963200  ;;  %v1044_v0 = vld [vmem:[%s1407_s4 + $0x80] sm:$0xff]  ;;  %v1052_v1 = vld [vmem:[%s1407_s4 + $0x88] sm:$0xff]  ;;  %vm1294_vm0 = vmmov 0   ;;  %vm550_vm1 = vcmask 130112   ;;  %vm557_vm2 = vcmask 195712  }
  0x2d   : > { %v245_v2 = vld [vmem:[%s1407_s4] sm:$0xff]  ;;  %v342_v3 = vadd.f32 %v1052_v1, %v1044_v0  ;;  %v253_v4 = vld [vmem:[%s1407_s4 + $0x8] sm:$0xff]  ;;  %v1045_v5 = vld [vmem:[%s1407_s4 + $0x90] sm:$0xff]  ;;  %v350_v27 = vmax.f32 %v1044_v0, %v1052_v1  ;;  %v1293_v0 = vmov 0.0   ;;  %vm564_vm3 = vcmask 261312   ;;  %s1043_s6 = sshll.u32 %s1403_s28, 1 }
  0x2e   : > { %v1053_v6 = vld [vmem:[%s1407_s4 + $0x98] sm:$0xff]  ;;  %v261_v7 = vadd.f32 %v253_v4, %v245_v2  ;;  %v246_v8 = vld [vmem:[%s1407_s4 + $0x10] sm:$0xff]  ;;  %v1046_v12 = vld [vmem:[%s1407_s4 + $0xa0] sm:$0xff]  ;;  %v269_v25 = vmax.f32 %v245_v2, %v253_v4  ;;  %1083 = vmatprep.subr.mxu0 %v1293_v0  ;;  %1102 = vmatprep.subr.mxu1 %v1293_v0  ;;  %vm571_vm4 = vcmask 326912   ;;  %vm578_vm5 = vcmask 392512   ;;  %s1071_s7 = sshll.u32 %s1280_s15, 5 }
  0x2f   : > { %v254_v9 = vld [vmem:[%s1407_s4 + $0x18] sm:$0xff]  ;;  %443 = vadd.xlane.f32.xlu1 %v342_v3  ;;  %v343_v10 = vadd.f32 %v1053_v6, %v1045_v5  ;;  %v1054_v13 = vld [vmem:[%s1407_s4 + $0xa8] sm:$0xff]  ;;  %v247_v14 = vld [vmem:[%s1407_s4 + $0x20] sm:$0xff]  ;;  %v351_v26 = vmax.f32 %v1045_v5, %v1053_v6  ;;  %1099 = vmatprep.mubr.msk.f32.mxu0 %vm1294_vm0, %v1293_v0  ;;  %vm585_vm6 = vcmask 458112   ;;  %vm592_vm7 = vcmask 523712   ;;  %s205_s8 = scalar_lea.vmem [#allocation7], %s1043_s6  ;;  %s1596_s18 = scalar_lea.hbm %s1649_s3, %s1071_s7 }
  0x30   : > { %427 = vadd.xlane.f32.xlu0 %v261_v7  ;;  %v262_v11 = vadd.f32 %v254_v9, %v246_v8  ;;  %v255_v15 = vld [vmem:[%s1407_s4 + $0x28] sm:$0xff]  ;;  %v344_v16 = vadd.f32 %v1054_v13, %v1046_v12  ;;  %v1047_v18 = vld [vmem:[%s1407_s4 + $0xb0] sm:$0xff]  ;;  %v1055_v19 = vld [vmem:[%s1407_s4 + $0xb8] sm:$0xff]  ;;  %v270_v24 = vmax.f32 %v246_v8, %v254_v9  ;;  %v352_v34 = vmax.f32 %v1046_v12, %v1054_v13  ;;  %s949_s9 = sshll.u32 %s205_s8, 4  ;;  %s936_s19 = scalar_lea.sflag [#allocation6], %s1403_s28  ;;  %s1598_s9 = int_to_ptr.vmem [resolvable:$true] %s949_s9 }
  0x31   : > { %v263_v17 = vadd.f32 %v255_v15, %v247_v14  ;;  %v248_v20 = vld [vmem:[%s1407_s4 + $0x30] sm:$0xff]  ;;  %v256_v21 = vld [vmem:[%s1407_s4 + $0x38] sm:$0xff]  ;;  %v345_v22 = vadd.f32 %v1055_v19, %v1047_v18  ;;  %v1048_v28 = vld [vmem:[%s1407_s4 + $0xc0] sm:$0xff]  ;;  %v271_v35 = vmax.f32 %v247_v14, %v255_v15  ;;  %v353_v42 = vmax.f32 %v1047_v18, %v1055_v19  ;;  %1104 = vmatprep.mubr.msk.f32.mxu1 %vm1294_vm0, %v1293_v0  ;;  %s1208_s15 = scalar_lea.vmem %s1598_s9, 32  ;;  %s1296_s21 = smov [#allocation7]  }
  0x32   : > { %v264_v23 = vadd.f32 %v256_v21, %v248_v20  ;;  %v1056_v29 = vld [vmem:[%s1407_s4 + $0xc8] sm:$0xff]  ;;  %v249_v30 = vld [vmem:[%s1407_s4 + $0x40] sm:$0xff]  ;;  %v1049_v36 = vld [vmem:[%s1407_s4 + $0xd0] sm:$0xff]  ;;  %v272_v43 = vmax.f32 %v248_v20, %v256_v21  ;;  %vm633_vm8 = vcmask 1041409   ;;  %vm730_vm9 = vcmask 1043459   ;;  %p1209_p8 = scmp.ne.s32.totalorder %s1598_s9, %s1208_s15  ;;  %s1212_s22 = sshll.u32 %s1296_s21, 4  ;;  %s1213_s22 = int_to_ptr.vmem [resolvable:$false] %s1212_s22 }
  0x33   : > { %445 = vadd.xlane.f32.xlu1 %v343_v10  ;;  %v257_v31 = vld [vmem:[%s1407_s4 + $0x48] sm:$0xff]  ;;  %v346_v32 = vadd.f32 %v1056_v29, %v1048_v28  ;;  %v1057_v37 = vld [vmem:[%s1407_s4 + $0xd8] sm:$0xff]  ;;  %v250_v38 = vld [vmem:[%s1407_s4 + $0x50] sm:$0xff]  ;;  %v354_v50 = vmax.f32 %v1048_v28, %v1056_v29  ;;  %vm733_vm10 = vcmask 1041408   ;;  %vm744_vm11 = vcmask 523264   ;;  %s1214_s23 = scalar_lea.vmem %s1213_s22, 64  ;;  %p1215_p1 = scmp.lt.s32.totalorder %s1598_s9, %s1213_s22 }
  0x34   : > { %429 = vadd.xlane.f32.xlu0 %v262_v11  ;;  %v265_v33 = vadd.f32 %v257_v31, %v249_v30  ;;  %v258_v39 = vld [vmem:[%s1407_s4 + $0x58] sm:$0xff]  ;;  %v347_v40 = vadd.f32 %v1057_v37, %v1049_v36  ;;  %v1050_v44 = vld [vmem:[%s1407_s4 + $0xe0] sm:$0xff]  ;;  %v1058_v45 = vld [vmem:[%s1407_s4 + $0xe8] sm:$0xff]  ;;  %v273_v51 = vmax.f32 %v249_v30, %v257_v31  ;;  %v355_v58 = vmax.f32 %v1049_v36, %v1057_v37  ;;  %p1210_p12 = pnand %p1209_p8, %p1370_p9  ;;  %p1216_p3 = scmp.lt.s32.totalorder %s1214_s23, %s1208_s15 }
  0x35   : > { %v266_v41 = vadd.f32 %v258_v39, %v250_v38  ;;  %v251_v46 = vld [vmem:[%s1407_s4 + $0x60] sm:$0xff]  ;;  %v259_v47 = vld [vmem:[%s1407_s4 + $0x68] sm:$0xff]  ;;  %v348_v48 = vadd.f32 %v1058_v45, %v1050_v44  ;;  %v1051_v52 = vld [vmem:[%s1407_s4 + $0xf0] sm:$0xff]  ;;  %v274_v59 = vmax.f32 %v250_v38, %v258_v39  ;;  %v356_v60 = vmax.f32 %v1050_v44, %v1058_v45 }
  0x36   : > { %v267_v49 = vadd.f32 %v259_v47, %v251_v46  ;;  %v1059_v53 = vld [vmem:[%s1407_s4 + $0xf8] sm:$0xff]  ;;  %v252_v54 = vld [vmem:[%s1407_s4 + $0x70] sm:$0xff]  ;;  %v275_v61 = vmax.f32 %v251_v46, %v259_v47  ;;  %v740_v3 = vld [vmem:[%s1647_s1 + $0x28] sm:$0xff]  ;;  %vm823_vm12 = vcmask 1043456   ;;  %vm819_vm13 = vcmask 31744   ;;  %p1211_p0 = pneg %p1210_p12  ;;  %p1217_p5 = por %p1216_p3, %p1215_p1 }
  0x37   : > { %447 = vadd.xlane.f32.xlu1 %v344_v16  ;;  %v260_v55 = vld [vmem:[%s1407_s4 + $0x78] sm:$0xff]  ;;  %v349_v56 = vadd.f32 %v1059_v53, %v1051_v52  ;;  %v357_v62 = vmax.f32 %v1051_v52, %v1059_v53  ;;  %v741_v2 = vld [vmem:[%s1647_s1 + $0x30] sm:$0xff]  ;;  %v739_v4 = vld [vmem:[%s1647_s1 + $0x20] sm:$0xff]  ;;  %vm932_vm14 = vcmask 516096  }
  0x38   : > { %431 = vadd.xlane.f32.xlu0 %v263_v17  ;;  %v268_v57 = vadd.f32 %v260_v55, %v252_v54  ;;  %v276_v63 = vmax.f32 %v252_v54, %v260_v55  ;;  %v742_v1 = vld [vmem:[%s1647_s1 + $0x38] sm:$0xff]  ;;  %v737_v6 = vld [vmem:[%s1647_s1 + $0x10] sm:$0xff]  ;;  %v736_v7 = vld [vmem:[%s1647_s1 + $0x8] sm:$0xff]  ;;  %p1218_p6 = pnand %p1217_p5, %p1211_p0 }
  0x39   : > { %1084 = vmatpush3.msra.mxu0 %v742_v1  ;;  %v738_v5 = vld [vmem:[%s1647_s1 + $0x18] sm:$0xff]  ;;  %v735_v8 = vld [vmem:[%s1647_s1] sm:$0xff] }
  0x3a   : > { %1085 = vmatprep.subr.mxu0 %v1293_v0 }
  0x3b   : > { %449 = vadd.xlane.f32.xlu1 %v345_v22  ;;  %1086 = vmatpush3.msra.mxu0 %v741_v2 }
  0x3c   : > { %433 = vadd.xlane.f32.xlu0 %v264_v23  ;;  %1087 = vmatprep.subr.mxu0 %v1293_v0 }
  0x3d   : > { %1088 = vmatpush3.msra.mxu0 %v740_v3 }
  0x3e   : > { %1089 = vmatprep.subr.mxu0 %v1293_v0 }
  0x3f   : > { %493 = vmax.xlane.f32.xlu1 %v270_v24  ;;  %1090 = vmatpush3.msra.mxu0 %v739_v4 }
  0x40   : > { %491 = vmax.xlane.f32.xlu0 %v269_v25  ;;  %1091 = vmatprep.subr.mxu0 %v1293_v0  ;;  %v539_v25 = vlaneseq }
  0x41   : > { %1092 = vmatpush3.msra.mxu0 %v738_v5 }
  0x42   : > { %1093 = vmatprep.subr.mxu0 %v1293_v0  ;;  %v540_v28 = vand.u32 127, %v539_v25  ;;  %v1481_v29 = vshrl.u32 %v539_v25, 7 }
  0x43   : > { %509 = vmax.xlane.f32.xlu1 %v351_v26  ;;  %1094 = vmatpush3.msra.mxu0 %v737_v6 }
  0x44   : > { %507 = vmax.xlane.f32.xlu0 %v350_v27  ;;  %1095 = vmatprep.subr.mxu0 %v1293_v0  ;;  %v545_v31 = vadd.s32 4294967288, %v540_v28  ;;  %v580_v47 = vadd.s32 4294967248, %v540_v28  ;;  %v587_v52 = vadd.s32 4294967240, %v540_v28 }
  0x45   : > { %1096 = vmatpush3.msra.mxu0 %v736_v7 }
  0x46   : > { %1097 = vmatprep.subr.mxu0 %v1293_v0  ;;  %v1491_v37 = vsub.s32 %v545_v31, %v1481_v29  ;;  %v1520_v3 = vsub.s32 %v587_v52, %v1481_v29 }
  0x47   : > { %451 = vadd.xlane.f32.xlu1 %v346_v32  ;;  %1098 = vmatpush3.msra.mxu0 %v735_v8  ;;  %v552_v32 = vadd.s32 4294967280, %v540_v28 }
  0x48   : > { %435 = vadd.xlane.f32.xlu0 %v265_v33 }
  0x49   : > { %v1494_v39 = vsub.s32 %v552_v32, %v1481_v29 }
  0x4b   : > { %511 = vmax.xlane.f32.xlu1 %v352_v34  ;;  %v559_v34 = vadd.s32 4294967272, %v540_v28 }
  0x4c   : > { %495 = vmax.xlane.f32.xlu0 %v271_v35  ;;  %v1488_v35 = vsub.s32 %v540_v28, %v1481_v29 }
  0x4d   : > { %v1497_v46 = vsub.s32 %v559_v34, %v1481_v29 }
  0x4f   : > { %453 = vadd.xlane.f32.xlu1 %v347_v40 }
  0x50   : > { %437 = vadd.xlane.f32.xlu0 %v266_v41 }
  0x53   : > { %513 = vmax.xlane.f32.xlu1 %v353_v42  ;;  %v566_v42 = vadd.s32 4294967264, %v540_v28 }
  0x54   : > { %497 = vmax.xlane.f32.xlu0 %v272_v43  ;;  %v573_v43 = vadd.s32 4294967256, %v540_v28 }
  0x57   : > { %455 = vadd.xlane.f32.xlu1 %v348_v48 }
  0x58   : > { %439 = vadd.xlane.f32.xlu0 %v267_v49 }
  0x5b   : > { %515 = vmax.xlane.f32.xlu1 %v354_v50 }
  0x5c   : > { %499 = vmax.xlane.f32.xlu0 %v273_v51 }
  0x5f   : > { %457 = vadd.xlane.f32.xlu1 %v349_v56 }
  0x60   : > { %441 = vadd.xlane.f32.xlu0 %v268_v57  ;;  %v1506_v57 = vsub.s32 %v566_v42, %v1481_v29 }
  0x63   : > { %517 = vmax.xlane.f32.xlu1 %v355_v58 }
  0x64   : > { %501 = vmax.xlane.f32.xlu0 %v274_v59  ;;  %v1509_v59 = vsub.s32 %v573_v43, %v1481_v29 }
  0x67   : > { %519 = vmax.xlane.f32.xlu1 %v356_v60 }
  0x68   : > { %503 = vmax.xlane.f32.xlu0 %v275_v61 }
  0x6b   : > { %521 = vmax.xlane.f32.xlu1 %v357_v62 }
  0x6c   : > { %505 = vmax.xlane.f32.xlu0 %v276_v63  ;;  %v1514_v63 = vsub.s32 %v580_v47, %v1481_v29 }
  0xb8   : > { %v444_v9 = vpop.xlane.xlu1 %443 }
  0xb9   : > { %v428_v10 = vpop.xlane.xlu0 %427  ;;  %v467_v44 = vmul.f32 0.00390625, %v444_v9 }
  0xba   : > { %v459_v48 = vmul.f32 0.00390625, %v428_v10 }
  0xbb   : > { %v597_v60 = vrot.slane %v467_v44, %v1488_v35 }
  0xbc   : > { %v446_v11 = vpop.xlane.xlu1 %445  ;;  %v544_v0 = vrot.slane %v459_v48, %v1488_v35 }
  0xbd   : > { %v430_v12 = vpop.xlane.xlu0 %429  ;;  %v468_v38 = vmul.f32 0.00390625, %v446_v11 }
  0xbe   : > { %v460_v41 = vmul.f32 0.00390625, %v430_v12 }
  0xbf   : > { %v601_v53 = vrot.slane %v468_v38, %v1491_v37 }
  0xc0   : > { %v448_v13 = vpop.xlane.xlu1 %447  ;;  %v549_v56 = vrot.slane %v460_v41, %v1491_v37 }
  0xc1   : > { %v432_v14 = vpop.xlane.xlu0 %431  ;;  %v469_v45 = vmul.f32 0.00390625, %v448_v13  ;;  %v602_v5 = vsel %vm550_vm1, %v601_v53, %v597_v60 }
  0xc2   : > { %v461_v49 = vmul.f32 0.00390625, %v432_v14  ;;  %v551_v10 = vsel %vm550_vm1, %v549_v56, %v544_v0 }
  0xc3   : > { %v606_v61 = vrot.slane %v469_v45, %v1494_v39 }
  0xc4   : > { %v450_v15 = vpop.xlane.xlu1 %449  ;;  %v556_v1 = vrot.slane %v461_v49, %v1494_v39 }
  0xc5   : > { %v434_v16 = vpop.xlane.xlu0 %433  ;;  %v470_v50 = vmul.f32 0.00390625, %v450_v15  ;;  %v607_v14 = vsel %vm557_vm2, %v606_v61, %v602_v5 }
  0xc6   : > { %v462_v54 = vmul.f32 0.00390625, %v434_v16 }
  0xc7   : > { %v611_v2 = vrot.slane %v470_v50, %v1497_v46 }
  0xc8   : > { %v1469_v17 = vpop.xlane.xlu1 %493  ;;  %v563_v6 = vrot.slane %v462_v54, %v1497_v46 }
  0xc9   : > { %v1471_v18 = vpop.xlane.xlu0 %491  ;;  %v659_v7 = vrot.slane %v1469_v17, %v1491_v37 }
  0xca   : > { %v655_v8 = vrot.slane %v1471_v18, %v1488_v35  ;;  %v558_v18 = vsel %vm557_vm2, %v556_v1, %v551_v10 }
  0xcc   : > { %v1473_v19 = vpop.xlane.xlu1 %509 }
  0xcd   : > { %v1475_v20 = vpop.xlane.xlu0 %507  ;;  %v698_v11 = vrot.slane %v1473_v19, %v1491_v37  ;;  %v565_v19 = vsel %vm564_vm3, %v563_v6, %v558_v18 }
  0xce   : > { %v694_v12 = vrot.slane %v1475_v20, %v1488_v35  ;;  %v660_v20 = vsel %vm550_vm1, %v659_v7, %v655_v8 }
  0xd0   : > { %v452_v21 = vpop.xlane.xlu1 %451  ;;  %v699_v35 = vsel %vm550_vm1, %v698_v11, %v694_v12  ;;  %v743_v12 = vld [vmem:[%s1648_s2] sm:$0xf] }
  0xd1   : > { %v436_v22 = vpop.xlane.xlu0 %435  ;;  %v471_v58 = vmul.f32 0.00390625, %v452_v21  ;;  %v612_v21 = vsel %vm564_vm3, %v611_v2, %v607_v14  ;;  %1103 = vmatpush3.msk.msra.mxu1 %vm823_vm12, %v743_v12 }
  0xd2   : > { %v463_v62 = vmul.f32 0.00390625, %v436_v22 }
  0xd3   : > { %v616_v13 = vrot.slane %v471_v58, %v1506_v57 }
  0xd4   : > { %v1477_v23 = vpop.xlane.xlu1 %511  ;;  %v570_v15 = vrot.slane %v463_v62, %v1506_v57 }
  0xd5   : > { %v1479_v24 = vpop.xlane.xlu0 %495  ;;  %v703_v31 = vrot.slane %v1477_v23, %v1494_v39 }
  0xd7   : > { %v704_v44 = vsel %vm557_vm2, %v703_v31, %v699_v35 }
  0xd8   : > { %v454_v26 = vpop.xlane.xlu1 %453 }
  0xd9   : > { %v438_v27 = vpop.xlane.xlu0 %437  ;;  %v472_v16 = vmul.f32 0.00390625, %v454_v26  ;;  %v617_v26 = vsel %vm571_vm4, %v616_v13, %v612_v21 }
  0xda   : > { %v464_v17 = vmul.f32 0.00390625, %v438_v27  ;;  %v664_v27 = vrot.slane %v1479_v24, %v1494_v39 }
  0xdb   : > { %v621_v38 = vrot.slane %v472_v16, %v1509_v59 }
  0xdc   : > { %v1483_v30 = vpop.xlane.xlu1 %513 }
  0xdd   : > { %v1485_v33 = vpop.xlane.xlu0 %497  ;;  %v708_v23 = vrot.slane %v1483_v30, %v1497_v46 }
  0xde   : > { %v669_v41 = vrot.slane %v1485_v33, %v1497_v46  ;;  %v665_v33 = vsel %vm557_vm2, %v664_v27, %v660_v20 }
  0xdf   : > { %v709_v53 = vsel %vm564_vm3, %v708_v23, %v704_v44 }
  0xe0   : > { %v456_v36 = vpop.xlane.xlu1 %455 }
  0xe1   : > { %v440_v40 = vpop.xlane.xlu0 %439  ;;  %v473_v22 = vmul.f32 0.00390625, %v456_v36  ;;  %v572_v36 = vsel %vm571_vm4, %v570_v15, %v565_v19 }
  0xe2   : > { %v465_v25 = vmul.f32 0.00390625, %v440_v40  ;;  %v577_v40 = vrot.slane %v464_v17, %v1509_v59 }
  0xe3   : > { %v626_v42 = vrot.slane %v473_v22, %v1514_v63 }
  0xe4   : > { %v1499_v51 = vpop.xlane.xlu1 %515  ;;  %v584_v43 = vrot.slane %v465_v25, %v1514_v63  ;;  %v579_v52 = vsel %vm578_vm5, %v577_v40, %v572_v36 }
  0xe5   : > { %v1502_v55 = vpop.xlane.xlu0 %499  ;;  %v713_v24 = vrot.slane %v1499_v51, %v1506_v57  ;;  %v622_v51 = vsel %vm578_vm5, %v621_v38, %v617_v26 }
  0xe6   : > { %v674_v45 = vrot.slane %v1502_v55, %v1506_v57  ;;  %v670_v55 = vsel %vm564_vm3, %v669_v41, %v665_v33  ;;  %v627_v56 = vsel %vm585_vm6, %v626_v42, %v622_v51  ;;  %v586_v57 = vsel %vm585_vm6, %v584_v43, %v579_v52 }
  0xe7   : > { %v714_v58 = vsel %vm571_vm4, %v713_v24, %v709_v53 }
  0xe8   : > { %v458_v4 = vpop.xlane.xlu1 %457 }
  0xe9   : > { %v442_v9 = vpop.xlane.xlu0 %441  ;;  %v474_v32 = vmul.f32 0.00390625, %v458_v4 }
  0xea   : > { %v466_v37 = vmul.f32 0.00390625, %v442_v9 }
  0xeb   : > { %v631_v47 = vrot.slane %v474_v32, %v1520_v3 }
  0xec   : > { %v518_v28 = vpop.xlane.xlu1 %517  ;;  %v591_v46 = vrot.slane %v466_v37, %v1520_v3 }
  0xed   : > { %v502_v34 = vpop.xlane.xlu0 %501  ;;  %v718_v30 = vrot.slane %v518_v28, %v1509_v59  ;;  %v632_v61 = vsel %vm592_vm7, %v631_v47, %v627_v56  ;;  %v1295_v28 = vmov 1966171168  }
  0xee   : > { %v679_v49 = vrot.slane %v502_v34, %v1509_v59  ;;  %v675_v59 = vsel %vm571_vm4, %v674_v45, %v670_v55  ;;  %v909_v19 = vunpack.c.l.s4 %v1295_v28 }
  0xef   : > { %v719_v62 = vsel %vm578_vm5, %v718_v30, %v714_v58 }
  0xf0   : > { %v520_v39 = vpop.xlane.xlu1 %519  ;;  %v680_v2 = vsel %vm578_vm5, %v679_v49, %v675_v59  ;;  %v910_v20 = vunpack.c.0.s8 %v909_v19 }
  0xf1   : > { %v504_v48 = vpop.xlane.xlu0 %503  ;;  %v723_v50 = vrot.slane %v520_v39, %v1514_v63 }
  0xf2   : > { %v684_v54 = vrot.slane %v504_v48, %v1514_v63  ;;  %v593_v63 = vsel %vm592_vm7, %v591_v46, %v586_v57  ;;  %v913_v31 = vsub.s32 %v910_v20, %v1481_v29 }
  0xf3   : > { %v724_v4 = vsel %vm585_vm6, %v723_v50, %v719_v62  ;;  %v634_v9 = vsel %vm633_vm8, %v632_v61, %v593_v63 }
  0xf4   : > { %v522_v60 = vpop.xlane.xlu1 %521  ;;  %v685_v6 = vsel %vm585_vm6, %v684_v54, %v680_v2 }
  0xf5   : > { %v728_v0 = vrot.slane %v522_v60, %v1520_v3  ;;  %v506_v1 = vpop.xlane.xlu0 %505 }
  0xf6   : > { %v689_v5 = vrot.slane %v506_v1, %v1520_v3 }
  0xf7   : > { %v729_v7 = vsel %vm592_vm7, %v728_v0, %v724_v4 }
  0xf8   : > { %v690_v8 = vsel %vm592_vm7, %v689_v5, %v685_v6 }
  0xf9   : > { %v731_v10 = vsel %vm730_vm9, %v729_v7, %v690_v8 }
  0xfa   : > { %v734_v11 = vsel %vm733_vm10, %v634_v9, %v731_v10 }
  0xfb   : > { %1100 = vmatmul.mubr.msk.f32.vlgmr.msra.gmra.mxu0 %vm744_vm11, %v734_v11 }
 0x1bb   : > { %v814_v3 = vpop.f32.mrf.mxu0 }
 0x1bc   : > { %v818_v13 = vmax.f32 %v814_v3, 0.0 }
 0x1bd   : > { %v1101_v14 = vpop.f32.mrf.mxu0 }
 0x1be   : > { %1105 = vmatmul.mubr.msk.f32.vlgmr.msra.gmra.mxu1 %vm819_vm13, %v818_v13 }
 0x27e   : > { %v893_v15 = vpop.f32.mrf.mxu1 }
 0x27f   : > { %v898_v16 = vrot.slane %v893_v15, 2 }
 0x280   : > { %v1106_v17 = vpop.f32.mrf.mxu1 }
 0x281   : > { %v900_v18 = vadd.f32 %v898_v16, %v893_v15 }
 0x283   : > { %v1063_v21 = vmul.f32 -1.442695, %v900_v18 }
 0x285   : > { %1176 = vpow2.f32 %v1063_v21 }
 0x292   : > { %v1177_v22 = vpop.eup %1176 }
 0x293   : > { %v904_v25 = vadd.f32 1.0, %v1177_v22 }
 0x295   : > { %1178 = vrcp.f32 %v904_v25 }
 0x2a2   : > { %v1179_v32 = vpop.eup %1178 }
 0x2a3   : > { %v914_v34 = vrot.slane %v1179_v32, %v913_v31 }
 0x2a5   : > { %v915_v35 = vcombine.high %v914_v34, %v914_v34  ;;  %v922_v26 = vrot.slane %v914_v34, %v913_v31 }
 0x2a7   : > { %v929_v29 = vrot.slane %v915_v35, %v913_v31  ;;  %933 = vst.msk [vmem:[%s205_s8] sm:$0x1] %vm932_vm14, %v922_v26 }
 0x2a9   : > { %934 = vst.msk [vmem:[%s205_s8 + $0x1] sm:$0x1] %vm932_vm14, %v929_v29 }
 0x2aa   : > { %1221 = shalt.err (!%p1218_p6)
}
 0x2ab   : > { %s1222_s29 = scalar_lea.hbm %s1596_s18, 32  ;;  %s1226_s24 = scalar_lea.hbm %s1649_s3, 64 }
 0x2ac   : > { %p1223_p7 = scmp.ne.s32.totalorder %s1596_s18, %s1222_s29  ;;  %p1227_p13 = scmp.lt.s32.totalorder %s1596_s18, %s1649_s3 }
 0x2ad   : > { %p1228_p2 = scmp.lt.s32.totalorder %s1226_s24, %s1222_s29 }
 0x2ae   : > { %p1224_p10 = pnand %p1223_p7, %p1370_p9 }
 0x2af   : > { %p1229_p8 = por %p1228_p2, %p1227_p13 }
 0x2b0   : > { %p1225_p4 = pneg %p1224_p10 }
 0x2b2   : > { %p1230_p12 = pnand %p1229_p8, %p1225_p4 }
 0x2b4   : > { %1233 = shalt.err (!%p1230_p12)
}
 0x2b5   : > { %s1297_s7 = smov 16   ;;  %s1298_s8 = smov 1  }
 0x2b6   : > { %1109 = dma.vmem_to_hbm [thread:$0]  (%p1370_p9), %s1598_s9, 32, %s1596_s18, %s936_s19, %s1297_s7, %s1297_s7, %s1298_s8  }
 0x2b7 PF: > { %s964_s10 = sand.u32 1, %s1268_s12   ;;  %p1655_p0 = scmp.ge.s32.totalorder %s1288_s17, 2 }
 0x2b8   : > { %s965_s11 = scalar_lea.sflag [#allocation6], %s964_s10 }
 0x2b9   : > { %p1116_p1 = pnand %p1655_p0, %p1377_p11 }
 0x2bb   : > { %p1117_p3 = pneg %p1116_p1 }
 0x2bd   : > { %1263 = dma.done.wait (%p1117_p3), %s965_s11, 32  }
 0x2be   : > { %1265 = vsyncadd (%p1117_p3), %s965_s11, 4294967264  ;;  %s19_s17 = sadd.s32 1, %s1288_s17   ;;  %s1656_s12 = smov %s1272_s13 }
 0x2bf   : > { %p16_p5 = scmp.ge.s32.totalorder %s19_s17, 4   ;;  %s1657_s13 = smov %s1276_s14 }
 0x2c0   : > { %s1658_s14 = smov %s1375_s26  ;;  %s1659_s15 = smov %s1284_s16 }
 0x2c1   : > { %s1660_s16 = smov %s1662_s20  ;;  %18 = sbr.rel (!%p16_p5) target bundleno = 6 (0x6), region = 88 }
 0x2c6   :  { %970 = vsyncpa [#allocation5], 1 }
 0x2c7   :  { %972 = vsyncpa [#allocation5 + $0x1], 1 }
 0x2c8   :  { %973 = vsyncpa [#allocation6], 1 }
 0x2c9   :  { %975 = vsyncpa [#allocation6 + $0x1], 1 }

</bundles_post_ra>
